<compile_context>
chip_gen: v6e
topology: v6e:2x2x1
jax: 0.10.0
libtpu: 0.0.40
codegen_flags: <defaults>
</compile_context>

<pallas_src>
import functools

import jax
import jax.numpy as jnp
from jax.experimental import pallas as pl
from jax.experimental.pallas import tpu as pltpu

LOG_SIG_MAX = 2.0
LOG_SIG_MIN = -20.0


def _round_up(x, m):
    return ((x + m - 1) // m) * m


def _policy_kernel(x_ref, w12_ref, wh_ref, b_ref, out_ref, *,
                   in_pad, hidden_dim, num_actions):
    H, A = hidden_dim, num_actions
    cdt = w12_ref.dtype  # matmul-input dtype (f32 or bf16); accumulation is f32

    x = x_ref[...].astype(cdt)              # (block_b, in_pad), pre-padded columns

    # Static, tile-aligned views into the packed parameter buffers.
    w1 = w12_ref[0:in_pad, :]               # (in_pad, H); rows past num_inputs are 0
    w2 = w12_ref[in_pad:in_pad + H, :]      # (H, H)
    wh = wh_ref[...]                        # (H, n_pad) == [wm | wl | zero pad]
    n_pad = wh.shape[1]

    # Biases are kept f32 so the whole elementwise epilogue stays f32 (v5e VPU).
    b1 = b_ref[0:1, 0:H]
    b2 = b_ref[1:2, 0:H]
    bh = b_ref[2:3, 0:n_pad]

    # linear1 + ReLU  (padded-K matmul; padded x columns hit zero weight rows)
    h1 = jnp.dot(x, w1, preferred_element_type=jnp.float32) + b1
    h1 = jnp.maximum(h1, 0.0)

    # linear2 + ReLU
    h2 = jnp.dot(h1.astype(cdt), w2, preferred_element_type=jnp.float32) + b2
    h2 = jnp.maximum(h2, 0.0)

    # Fused heads: one matmul, one lane-dense (block_b, n_pad) store.
    y = jnp.dot(h2.astype(cdt), wh, preferred_element_type=jnp.float32) + bh

    # Clamp only the log_std half (columns >= A) via a VPU mask so the output
    # store stays a single dense store. Padded columns (>= 2A) are zeros, also
    # land on the clamp branch, and are sliced off in the wrapper.
    col = jax.lax.broadcasted_iota(jnp.int32, y.shape, 1)
    y_clamped = jnp.clip(y, LOG_SIG_MIN, LOG_SIG_MAX)
    out_ref[...] = jnp.where(col >= A, y_clamped, y).astype(out_ref.dtype)


def pack_params(params, compute_dtype=jnp.float32):
    """Pack the 8 parameter tensors into 3 buffers (done once, off hot path).

    compute_dtype=jnp.bfloat16 halves weight/input DMA bytes on all of
    v5e/v6e/v7x (MXU is bf16 everywhere); accumulation/epilogue stay f32.
    """
    w1 = jnp.asarray(params["w1"], jnp.float32)
    w2 = jnp.asarray(params["w2"], jnp.float32)
    wm = jnp.asarray(params["wm"], jnp.float32)
    wl = jnp.asarray(params["wl"], jnp.float32)

    num_inputs, H = w1.shape
    A = wm.shape[1]
    # Pad linear1's K to a multiple of 16 so all in-kernel slices stay on
    # sublane/tile boundaries for both f32 and bf16 (no hidden VMEM copies).
    in_pad = _round_up(num_inputs, 16)
    # Pad the fused-head output width to a 128-lane multiple: dense final store
    # (no masked vst.msk) and a full MXU N dimension for the head matmul.
    n_pad = _round_up(2 * A, 128)

    w12 = jnp.zeros((in_pad + H, H), jnp.float32)
    w12 = w12.at[:num_inputs, :].set(w1).at[in_pad:in_pad + H, :].set(w2)

    wh = jnp.zeros((H, n_pad), jnp.float32)
    wh = wh.at[:, :A].set(wm).at[:, A:2 * A].set(wl)

    W = max(H, n_pad)
    b = jnp.zeros((3, W), jnp.float32)
    b = b.at[0, :H].set(jnp.asarray(params["b1"]).reshape(-1))
    b = b.at[1, :H].set(jnp.asarray(params["b2"]).reshape(-1))
    b = b.at[2, :A].set(jnp.asarray(params["bm"]).reshape(-1))
    b = b.at[2, A:2 * A].set(jnp.asarray(params["bl"]).reshape(-1))

    return {
        "w12": w12.astype(compute_dtype),
        "wh": wh.astype(compute_dtype),
        "b": b,                                 # biases stay f32 (exact, tiny)
        "num_inputs": num_inputs,
        "in_pad": in_pad,
        "n_pad": n_pad,
        "hidden_dim": H,
        "num_actions": A,
    }


def _pick_block_b(B):
    # Tiny batches: one block (no point splitting). Otherwise force >= 2 grid
    # steps so v7x's second TensorCore gets work via the "parallel" batch axis,
    # while keeping tiles large (up to 1024 rows) so the ~0.35 us per-grid-step
    # overhead stays negligible on mem-bound v5e/v6e.
    if B <= 64:
        return B
    return min(_round_up(pl.cdiv(B, 2), 16), 1024)


def gaussian_policy_forward(state, packed):
    """GaussianPolicy.forward. Returns (mean, log_std)."""
    B = state.shape[0]
    num_inputs = packed["num_inputs"]
    in_pad = packed["in_pad"]
    n_pad = packed["n_pad"]
    H = packed["hidden_dim"]
    A = packed["num_actions"]
    w12, wh, b = packed["w12"], packed["wh"], packed["b"]
    cdt = w12.dtype

    # Cast state to the matmul dtype at the boundary (halves the dominant input
    # HBM stream in the bf16 path) and zero-pad its K once so the kernel's first
    # matmul uses a tile-aligned weight view.
    state_p = state.astype(cdt)
    if in_pad != num_inputs:
        state_p = jnp.pad(state_p, ((0, 0), (0, in_pad - num_inputs)))

    block_b = _pick_block_b(B)
    grid = (pl.cdiv(B, block_b),)

    kernel = functools.partial(
        _policy_kernel, in_pad=in_pad, hidden_dim=H, num_actions=A)

    itemsize = jnp.dtype(cdt).itemsize
    flops = 2 * B * (in_pad * H + H * H + H * n_pad)
    bytes_accessed = (state_p.nbytes + w12.nbytes + wh.nbytes + b.nbytes
                      + B * n_pad * 4)

    # Explicit VMEM budget: double-buffered IO tiles + (double-buffered) params
    # + f32 activations + headroom.  Default scoped VMEM is only 16/32 MiB.
    vmem_bytes = (2 * (block_b * in_pad * itemsize + block_b * n_pad * 4)
                  + 2 * (w12.nbytes + wh.nbytes + b.nbytes)
                  + 3 * block_b * max(H, n_pad) * 4
                  + (4 << 20))
    vmem_limit = int(min(max(vmem_bytes, 32 << 20), 128 << 20))

    # TODO(synk): for very large hidden_dim (param footprint approaching v7x's
    # 64 MiB per-TC VMEM), tile linear2 over K with an "arbitrary" reduction
    # grid axis + f32 accumulator scratch, and single-buffer the constant-index
    # weight specs (pl.Buffered(1)) to halve their VMEM footprint.
    y = pl.pallas_call(
        kernel,
        out_shape=jax.ShapeDtypeStruct((B, n_pad), jnp.float32),
        grid=grid,
        in_specs=[
            pl.BlockSpec((block_b, in_pad), lambda i: (i, 0)),
            pl.BlockSpec(w12.shape, lambda i: (0, 0)),   # VMEM-resident weights
            pl.BlockSpec(wh.shape, lambda i: (0, 0)),
            pl.BlockSpec(b.shape, lambda i: (0, 0)),
        ],
        out_specs=pl.BlockSpec((block_b, n_pad), lambda i: (i, 0)),
        compiler_params=pltpu.CompilerParams(
            dimension_semantics=("parallel",),
            vmem_limit_bytes=vmem_limit,
        ),
        cost_estimate=pl.CostEstimate(
            flops=flops, transcendentals=0, bytes_accessed=bytes_accessed),
    )(state_p, w12, wh, b)

    mean = y[:, :A]
    log_std = y[:, A:2 * A]
    return mean, log_std


def xavier_uniform(key, fan_in, fan_out, gain=1.0):
    # matches torch.nn.init.xavier_uniform_ (gain=1), stored as (in, out)
    limit = gain * jnp.sqrt(6.0 / (fan_in + fan_out))
    return jax.random.uniform(key, (fan_in, fan_out), jnp.float32, -limit, limit)


def init_params(key, num_inputs, num_actions, hidden_dim):
    k1, k2, k3, k4 = jax.random.split(key, 4)
    return {
        "w1": xavier_uniform(k1, num_inputs, hidden_dim),
        "b1": jnp.zeros((1, hidden_dim), jnp.float32),
        "w2": xavier_uniform(k2, hidden_dim, hidden_dim),
        "b2": jnp.zeros((1, hidden_dim), jnp.float32),
        "wm": xavier_uniform(k3, hidden_dim, num_actions),
        "bm": jnp.zeros((1, num_actions), jnp.float32),
        "wl": xavier_uniform(k4, hidden_dim, num_actions),
        "bl": jnp.zeros((1, num_actions), jnp.float32),
    }


def forward_ref(state, p):
    # pure-JAX reference for correctness check
    h1 = jnp.maximum(state @ p["w1"] + p["b1"], 0.0)
    h2 = jnp.maximum(h1 @ p["w2"] + p["b2"], 0.0)
    mean = h2 @ p["wm"] + p["bm"]
    log_std = jnp.clip(h2 @ p["wl"] + p["bl"], LOG_SIG_MIN, LOG_SIG_MAX)
    return mean, log_std


if __name__ == "__main__":
    key = jax.random.PRNGKey(0)
    k_param, k_state = jax.random.split(key)

    batch = 2
    num_inputs = 16
    num_actions = 8
    hidden_dim = 32

    params = init_params(k_param, num_inputs, num_actions, hidden_dim)
    state = jax.random.normal(k_state, (batch, num_inputs), jnp.float32)

    mean_ref_, log_std_ref_ = forward_ref(state, params)

    # f32 matmul path: matches the reference to tight tolerance.
    packed_f32 = pack_params(params, compute_dtype=jnp.float32)
    mean, log_std = gaussian_policy_forward(state, packed_f32)
    jax.block_until_ready((mean, log_std))
    assert mean.shape == (batch, num_actions)
    assert log_std.shape == (batch, num_actions)
    assert jnp.allclose(mean, mean_ref_, atol=1e-5)
    assert jnp.allclose(log_std, log_std_ref_, atol=1e-5)

    # bf16 matmul-input path (recommended on v5e/v6e/v7x): f32 accumulation +
    # f32 epilogue, loose tolerance vs. the f32 reference.
    packed_bf16 = pack_params(params, compute_dtype=jnp.bfloat16)
    mean_b, log_std_b = gaussian_policy_forward(state, packed_bf16)
    jax.block_until_ready((mean_b, log_std_b))
    assert jnp.allclose(mean_b, mean_ref_, atol=5e-2, rtol=5e-2)
    assert jnp.allclose(log_std_b, log_std_ref_, atol=5e-2, rtol=5e-2)

    # TODO(synk): .sample() (Normal rsample + sigmoid squash + log_prob) is
    # stochastic inference glue outside forward(); not implemented in-kernel.

    print("KERNEL_OK")
</pallas_src>

<mosaic_0001>
module attributes {stable_mosaic.version = 11 : i64} {
  func.func @_policy_kernel(%arg0: i32, %arg1: memref<2x16xf32, #tpu.memory_space<vmem>>, %arg2: memref<48x32xf32, #tpu.memory_space<vmem>>, %arg3: memref<32x128xf32, #tpu.memory_space<vmem>>, %arg4: memref<3x128xf32, #tpu.memory_space<vmem>>, %arg5: memref<2x128xf32, #tpu.memory_space<vmem>>) attributes {dimension_semantics = [#tpu.dimension_semantics<parallel>], iteration_bounds = array<i64: 1>, scalar_prefetch = 0 : i64, scratch_operands = 0 : i64, tpu.core_type = #tpu.core_type<tc>, window_params = [{transform_indices = @transform_0, window_bounds = array<i64: 2, 16>}, {pipeline_mode = #tpu.pipeline_mode<synchronous>, transform_indices = @transform_1, window_bounds = array<i64: 48, 32>}, {pipeline_mode = #tpu.pipeline_mode<synchronous>, transform_indices = @transform_2, window_bounds = array<i64: 32, 128>}, {pipeline_mode = #tpu.pipeline_mode<synchronous>, transform_indices = @transform_3, window_bounds = array<i64: 3, 128>}, {transform_indices = @transform_4, window_bounds = array<i64: 2, 128>}]} {
    %c0 = arith.constant 0 : index
    %c0_0 = arith.constant 0 : index
    %0 = vector.load %arg1[%c0, %c0_0] : memref<2x16xf32, #tpu.memory_space<vmem>>, vector<2x16xf32>
    %c0_1 = arith.constant 0 : index
    %c0_2 = arith.constant 0 : index
    %1 = vector.load %arg2[%c0_1, %c0_2] : memref<48x32xf32, #tpu.memory_space<vmem>>, vector<16x32xf32>
    %c16 = arith.constant 16 : index
    %c0_3 = arith.constant 0 : index
    %2 = vector.load %arg2[%c16, %c0_3] : memref<48x32xf32, #tpu.memory_space<vmem>>, vector<32x32xf32>
    %c0_4 = arith.constant 0 : index
    %c0_5 = arith.constant 0 : index
    %3 = vector.load %arg3[%c0_4, %c0_5] : memref<32x128xf32, #tpu.memory_space<vmem>>, vector<32x128xf32>
    %c0_6 = arith.constant 0 : index
    %c0_7 = arith.constant 0 : index
    %4 = vector.load %arg4[%c0_6, %c0_7] : memref<3x128xf32, #tpu.memory_space<vmem>>, vector<1x32xf32>
    %c1 = arith.constant 1 : index
    %c0_8 = arith.constant 0 : index
    %5 = vector.load %arg4[%c1, %c0_8] : memref<3x128xf32, #tpu.memory_space<vmem>>, vector<1x32xf32>
    %c2 = arith.constant 2 : index
    %c0_9 = arith.constant 0 : index
    %6 = vector.load %arg4[%c2, %c0_9] : memref<3x128xf32, #tpu.memory_space<vmem>>, vector<1x128xf32>
    %cst = arith.constant dense<0.000000e+00> : vector<2x32xf32>
    %7 = tpu.matmul %0, %1, %cst {dimension_numbers = #tpu.dot_dimension_numbers<[1], [0], [0], [1], [0, 0, 1, 1], [], []>} : vector<2x16xf32>, vector<16x32xf32>, vector<2x32xf32> -> vector<2x32xf32>
    %8 = vector.broadcast %4 : vector<1x32xf32> to vector<2x32xf32>
    %9 = arith.addf %7, %8 : vector<2x32xf32>
    %cst_10 = arith.constant 0.000000e+00 : f32
    %10 = vector.broadcast %cst_10 : f32 to vector<2x32xf32>
    %11 = arith.maximumf %9, %10 : vector<2x32xf32>
    %cst_11 = arith.constant dense<0.000000e+00> : vector<2x32xf32>
    %12 = tpu.matmul %11, %2, %cst_11 {dimension_numbers = #tpu.dot_dimension_numbers<[1], [0], [0], [1], [0, 0, 1, 1], [], []>} : vector<2x32xf32>, vector<32x32xf32>, vector<2x32xf32> -> vector<2x32xf32>
    %13 = vector.broadcast %5 : vector<1x32xf32> to vector<2x32xf32>
    %14 = arith.addf %12, %13 : vector<2x32xf32>
    %cst_12 = arith.constant 0.000000e+00 : f32
    %15 = vector.broadcast %cst_12 : f32 to vector<2x32xf32>
    %16 = arith.maximumf %14, %15 : vector<2x32xf32>
    %cst_13 = arith.constant dense<0.000000e+00> : vector<2x128xf32>
    %17 = tpu.matmul %16, %3, %cst_13 {dimension_numbers = #tpu.dot_dimension_numbers<[1], [0], [0], [1], [0, 0, 1, 1], [], []>} : vector<2x32xf32>, vector<32x128xf32>, vector<2x128xf32> -> vector<2x128xf32>
    %18 = vector.broadcast %6 : vector<1x128xf32> to vector<2x128xf32>
    %19 = arith.addf %17, %18 : vector<2x128xf32>
    %20 = tpu.iota {dimensions = array<i32: 1>} : vector<2x128xi32>
    %cst_14 = arith.constant -2.000000e+01 : f32
    %cst_15 = arith.constant 2.000000e+00 : f32
    %21 = vector.broadcast %cst_14 : f32 to vector<2x128xf32>
    %22 = arith.maximumf %21, %19 : vector<2x128xf32>
    %23 = vector.broadcast %cst_15 : f32 to vector<2x128xf32>
    %24 = arith.minimumf %23, %22 : vector<2x128xf32>
    %c8_i32 = arith.constant 8 : i32
    %25 = vector.broadcast %c8_i32 : i32 to vector<2x128xi32>
    %26 = arith.cmpi sge, %20, %25 : vector<2x128xi32>
    %27 = arith.select %26, %24, %19 : vector<2x128xi1>, vector<2x128xf32>
    %c0_16 = arith.constant 0 : index
    %c0_17 = arith.constant 0 : index
    %28 = vector.load %arg5[%c0_16, %c0_17] : memref<2x128xf32, #tpu.memory_space<vmem>>, vector<2x128xf32>
    tpu.vector_store %arg5[%c0_16, %c0_17], %27 {strides = array<i32>} : memref<2x128xf32, #tpu.memory_space<vmem>>, vector<2x128xf32>,
    return
  }
  func.func @transform_0(%arg0: i32) -> (i32, i32) {
    %c0_i32 = arith.constant 0 : i32
    %c0_i32_0 = arith.constant 0 : i32
    return %arg0, %c0_i32 : i32, i32
  }
  func.func @transform_1(%arg0: i32) -> (i32, i32) {
    %c0_i32 = arith.constant 0 : i32
    %c0_i32_0 = arith.constant 0 : i32
    %c0_i32_1 = arith.constant 0 : i32
    return %c0_i32, %c0_i32_0 : i32, i32
  }
  func.func @transform_2(%arg0: i32) -> (i32, i32) {
    %c0_i32 = arith.constant 0 : i32
    %c0_i32_0 = arith.constant 0 : i32
    %c0_i32_1 = arith.constant 0 : i32
    return %c0_i32, %c0_i32_0 : i32, i32
  }
  func.func @transform_3(%arg0: i32) -> (i32, i32) {
    %c0_i32 = arith.constant 0 : i32
    %c0_i32_0 = arith.constant 0 : i32
    %c0_i32_1 = arith.constant 0 : i32
    return %c0_i32, %c0_i32_0 : i32, i32
  }
  func.func @transform_4(%arg0: i32) -> (i32, i32) {
    %c0_i32 = arith.constant 0 : i32
    %c0_i32_0 = arith.constant 0 : i32
    return %arg0, %c0_i32 : i32, i32
  }
}

</mosaic_0001>

<bundles_post_ra>
// kernel: tpu_custom_call.1
= control target key start
LH: loop header
LB: loop body
LE: loop exit
PB: predicated region body
PF: predicated region fallthrough
CT: control target
= control target key end

     0   :  { %v361_v1 = vmov 0.0   ;;  %vm362_vm0 = vmmov 0   ;;  %s436_s0 = inlined_call_operand.vmem [shape: f32[2,16], index: 0, kind: input, shape index: {}]   ;;  %s437_s1 = inlined_call_operand.vmem [shape: f32[48,32], index: 1, kind: input, shape index: {}]   ;;  %s438_s2 = inlined_call_operand.vmem [shape: f32[32,128], index: 2, kind: input, shape index: {}]   ;;  %s439_s3 = inlined_call_operand.vmem [shape: f32[3,128], index: 3, kind: input, shape index: {}]   ;;  %s440_s4 = inlined_call_operand.hbm [shape: f32[2,128], index: 4, kind: output, shape index: {}]  }
   0x1   :  { %v20_v0 = vld [vmem:[%s437_s1 + $0x8] sm:$0xff]  ;;  %307 = vmatprep.subr.mxu0 %v361_v1  ;;  %v19_v2 = vld [vmem:[%s437_s1] sm:$0xff]  ;;  %311 = vmatprep.mubr.msk.f32.mxu0 %vm362_vm0, %v361_v1 }
   0x2   :  { %v24_v3 = vld [vmem:[%s437_s1 + $0x28] sm:$0xff] }
   0x3   :  { %9 = vsyncpa [#allocation3], 0  ;;  %308 = vmatpush3.msra.mxu0 %v20_v0  ;;  %v18_v4 = vld [vmem:[%s436_s0] sm:$0x3]  ;;  %vm36_vm1 = vcmask 130048   ;;  %314 = vmatprep.subr.mxu1 %v361_v1  ;;  %v22_v6 = vld [vmem:[%s437_s1 + $0x18] sm:$0xff]  ;;  %v267_v22 = vlaneseq }
   0x4   :  { %309 = vmatprep.subr.mxu0 %v361_v1  ;;  %315 = vmatpush3.msra.mxu1 %v24_v3  ;;  %v23_v5 = vld [vmem:[%s437_s1 + $0x20] sm:$0xff]  ;;  %v21_v7 = vld [vmem:[%s437_s1 + $0x10] sm:$0xff]  ;;  %v28_v8 = vld [vmem:[%s438_s2 + $0x18] sm:$0xff]  ;;  %vm115_vm2 = vcmask 261120  }
   0x5   :  { %310 = vmatpush3.msra.mxu0 %v19_v2  ;;  %316 = vmatprep.subr.mxu1 %v361_v1  ;;  %v288_v9 = vld [vmem:[%s439_s3] ss:$0 sm:$0xff]  ;;  %v27_v14 = vld [vmem:[%s438_s2 + $0x10] sm:$0xff]  ;;  %v26_v15 = vld [vmem:[%s438_s2 + $0x8] sm:$0xff]  ;;  %v268_v25 = vand.u32 127, %v267_v22 }
   0x6   :  { %312 = vmatmul.mubr.msk.f32.vlgmr.msra.gmra.mxu0 %vm36_vm1, %v18_v4  ;;  %322 = vmatprep.mubr.msk.f32.mxu1 %vm362_vm0, %v361_v1  ;;  %v25_v16 = vld [vmem:[%s438_s2] sm:$0xff]  ;;  %s363_s2 = smov [#allocation2]  }
   0x7   :  { %325 = vmatprep.subr.mxu0 %v361_v1  ;;  %333 = vmatprep.mubr.msk.f32.mxu0 %vm362_vm0, %v361_v1  ;;  %v290_v17 = vld [vmem:[%s439_s3 + $0x1] ss:$0 sm:$0xff]  ;;  %v292_v23 = vld [vmem:[%s439_s3 + $0x2] ss:$0 sm:$0xff]  ;;  %s280_s15 = sshll.u32 %s363_s2, 4  ;;  %vm271_vm3 = vcmp.ge.s32.totalorder %v268_v25, 8  ;;  %s281_s15 = int_to_ptr.vmem [resolvable:$true] %s280_s15 }
   0x8   :  { %317 = vmatpush3.msra.mxu1 %v23_v5  ;;  %326 = vmatpush3.msra.mxu0 %v28_v8  ;;  %s339_s16 = scalar_lea.vmem %s281_s15, 32  ;;  %p344_p1 = scmp.lt.s32.totalorder %s281_s15, %s281_s15 }
   0x9   :  { %318 = vmatprep.subr.mxu1 %v361_v1  ;;  %327 = vmatprep.subr.mxu0 %v361_v1  ;;  %p340_p0 = scmp.ne.s32.totalorder %s281_s15, %s339_s16  ;;  %p345_p2 = scmp.lt.s32.totalorder %s339_s16, %s339_s16 }
   0xa   :  { %319 = vmatpush3.msra.mxu1 %v22_v6  ;;  %328 = vmatpush3.msra.mxu0 %v27_v14 }
   0xb   :  { %320 = vmatprep.subr.mxu1 %v361_v1  ;;  %329 = vmatprep.subr.mxu0 %v361_v1  ;;  %p346_p3 = por %p345_p2, %p344_p1 }
   0xc   :  { %321 = vmatpush3.msra.mxu1 %v21_v7  ;;  %330 = vmatpush3.msra.mxu0 %v26_v15 }
   0xd   :  { %331 = vmatprep.subr.mxu0 %v361_v1  ;;  %p347_p4 = pnand %p346_p3, %p340_p0 }
   0xe   :  { %332 = vmatpush3.msra.mxu0 %v25_v16 }
  0xc6   :  { %v106_v10 = vpop.f32.mrf.mxu0 }
  0xc7   :  { %v107_v11 = vadd.f32 %v288_v9, %v106_v10 }
  0xc8   :  { %v313_v12 = vpop.f32.mrf.mxu0 }
  0xc9   :  { %v110_v13 = vmax.f32 %v107_v11, 0.0 }
  0xcb   :  { %323 = vmatmul.mubr.msk.f32.vlgmr.msra.gmra.mxu1 %vm115_vm2, %v110_v13 }
 0x18b   :  { %v185_v18 = vpop.f32.mrf.mxu1 }
 0x18c   :  { %v186_v19 = vadd.f32 %v290_v17, %v185_v18 }
 0x18d   :  { %v324_v20 = vpop.f32.mrf.mxu1 }
 0x18e   :  { %v189_v21 = vmax.f32 %v186_v19, 0.0 }
 0x190   :  { %334 = vmatmul.mubr.msk.f32.vlgmr.msra.gmra.mxu0 %vm115_vm2, %v189_v21 }
 0x250   :  { %v263_v24 = vpop.f32.mrf.mxu0 }
 0x251   :  { %v264_v26 = vadd.f32 %v292_v23, %v263_v24 }
 0x252   :  { %v335_v27 = vpop.f32.mrf.mxu0 }
 0x253   :  { %v269_v28 = vmax.f32 %v264_v26, -20.0 }
 0x255   :  { %v270_v29 = vmin.f32 %v269_v28, 2.0 }
 0x257   :  { %v272_v30 = vsel %vm271_vm3, %v270_v29, %v264_v26 }
 0x258   :  { %273 = vst [vmem:[#allocation2] sm:$0x3] %v272_v30 }
 0x259   :  { %350 = shalt.err (!%p347_p4)
}
 0x25a   :  { %283 = dma.vmem_to_hbm [thread:$0]  %s281_s15, 32, %s440_s4, [#allocation3]  }
 0x25b   :  { %359 = dma.done.wait [#allocation3], 32  }
 0x25c   :  { %360 = vsyncadd [#allocation3], 4294967264 }
 0x25d   :  { %287 = vsyncpa [#allocation3], 1 }

</bundles_post_ra>
